<compile_context>
chip_gen: v6e
topology: v6e:2x2x1
jax: 0.10.0
libtpu: 0.0.40
codegen_flags: <defaults>
</compile_context>

<pallas_src>
import functools

import jax
import jax.numpy as jnp
from jax.experimental import pallas as pl
from jax.experimental.pallas import tpu as pltpu

_LANE = 128
_SUBLANE = 8
_TARGET_TILE_BYTES = 4 * 1024 * 1024   # ~4 MiB block; in+out double-buffered ~16 MiB
_VMEM_LIMIT_BYTES = 32 * 1024 * 1024


def _swish_kernel(x_ref, o_ref, *, beta):
    x = x_ref[...]
    xf = x.astype(jnp.float32)
    # swish(x) = x * sigmoid(beta * x); VPU muls + EUP sigmoid (free-ish slot).
    y = xf * jax.nn.sigmoid(xf * jnp.float32(beta))
    o_ref[...] = y.astype(o_ref.dtype)


def _pick_width(n):
    """Widest lane-dense slab width (multiple of 128) dividing n, else 128+pad."""
    for w in (4096, 2048, 1024, 512, 256, 128):
        if n % w == 0:
            return w, False
    return _LANE, True  # pad flat vector up to a multiple of 128


def swish(x, beta=1.0):
    """Elementwise Swish on an array of any shape (forward of netharn Swish)."""
    orig_shape = x.shape
    orig_dtype = x.dtype
    n = x.size

    width, needs_pad = _pick_width(n)
    flat = jnp.reshape(x, (-1,))  # row-major contiguous -> layout-preserving
    if needs_pad:
        n_pad = pl.cdiv(n, width) * width
        flat = jnp.pad(flat, (0, n_pad - n))  # swish(0) == 0; tail sliced off below
    else:
        n_pad = n

    rows = n_pad // width
    x2d = jnp.reshape(flat, (rows, width))

    # ~4 MiB tiles with rows a multiple of 8 (sublane), or the full row count
    # when the array is small (block == full array dim is always legal).
    itemsize = jnp.dtype(orig_dtype).itemsize
    target_rows = max(
        _SUBLANE,
        (_TARGET_TILE_BYTES // (width * itemsize)) // _SUBLANE * _SUBLANE,
    )
    tile_rows = rows if rows <= target_rows else target_rows

    grid = (pl.cdiv(rows, tile_rows),)

    out2d = pl.pallas_call(
        functools.partial(_swish_kernel, beta=float(beta)),
        out_shape=jax.ShapeDtypeStruct((rows, width), orig_dtype),
        grid_spec=pltpu.PrefetchScalarGridSpec(
            num_scalar_prefetch=0,
            grid=grid,
            in_specs=[pl.BlockSpec((tile_rows, width), lambda i: (i, 0))],
            out_specs=pl.BlockSpec((tile_rows, width), lambda i: (i, 0)),
        ),
        compiler_params=pltpu.CompilerParams(
            dimension_semantics=("parallel",),
            vmem_limit_bytes=_VMEM_LIMIT_BYTES,
        ),
    )(x2d)

    out_flat = jnp.reshape(out2d, (-1,))
    if needs_pad:
        out_flat = out_flat[:n]
    return jnp.reshape(out_flat, orig_shape)


class Swish:
    """JAX/Pallas equivalent of netharn.layers.swish.Swish (forward only)."""
    # TODO(synk): custom backward (_SwishFunction.backward) not implemented; forward only.

    def __init__(self, beta=1.0):
        self.beta = beta

    def __call__(self, x):
        return swish(x, beta=self.beta)


if __name__ == "__main__":
    key = jax.random.PRNGKey(0)

    # NCHW input, typical conv feature map (aligned, no-padding path).
    x = jax.random.normal(key, (2, 4, 16, 16), dtype=jnp.float32)
    module = Swish(beta=1.0)
    y = jax.block_until_ready(module(x))
    y_ref = x * jax.nn.sigmoid(x)
    assert y.shape == x.shape and y.dtype == x.dtype
    assert jnp.allclose(y, y_ref, atol=1e-6, rtol=1e-6)

    # Unaligned 1-D input with beta != 1 (padded/ragged path), matching the docstring test.
    x2 = jnp.linspace(-20.0, 20.0, 100, dtype=jnp.float32)
    module2 = Swish(beta=1.7)
    y2 = jax.block_until_ready(module2(x2))
    y2_ref = x2 * jax.nn.sigmoid(x2 * 1.7)
    assert y2.shape == x2.shape and y2.dtype == x2.dtype
    assert jnp.allclose(y2, y2_ref, atol=1e-6, rtol=1e-6)

    # bf16 input (cast-to-f32 compute path).
    x3 = jax.random.normal(key, (2, 4, 16, 16), dtype=jnp.bfloat16)
    y3 = jax.block_until_ready(Swish(beta=1.0)(x3))
    x3f = x3.astype(jnp.float32)
    y3_ref = (x3f * jax.nn.sigmoid(x3f)).astype(jnp.bfloat16)
    assert y3.shape == x3.shape and y3.dtype == x3.dtype
    assert jnp.allclose(y3.astype(jnp.float32), y3_ref.astype(jnp.float32), atol=1e-2, rtol=1e-2)

    print("KERNEL_OK")
</pallas_src>

<mosaic_0001>
module attributes {stable_mosaic.version = 11 : i64} {
  func.func @_swish_kernel(%arg0: i32, %arg1: memref<1x2048xf32, #tpu.memory_space<vmem>>, %arg2: memref<1x2048xf32, #tpu.memory_space<vmem>>) attributes {dimension_semantics = [#tpu.dimension_semantics<parallel>], iteration_bounds = array<i64: 1>, scalar_prefetch = 0 : i64, scratch_operands = 0 : i64, tpu.core_type = #tpu.core_type<tc>, window_params = [{transform_indices = @transform_0, window_bounds = array<i64: 1, 2048>}, {transform_indices = @transform_1, window_bounds = array<i64: 1, 2048>}]} {
    %c0 = arith.constant 0 : index
    %c0_0 = arith.constant 0 : index
    %0 = vector.load %arg1[%c0, %c0_0] : memref<1x2048xf32, #tpu.memory_space<vmem>>, vector<1x2048xf32>
    %cst = arith.constant 1.000000e+00 : f32
    %1 = vector.broadcast %cst : f32 to vector<1x2048xf32>
    %2 = arith.mulf %0, %1 : vector<1x2048xf32>
    %3 = arith.negf %2 : vector<1x2048xf32>
    %4 = math.exp %3 : vector<1x2048xf32>
    %cst_1 = arith.constant 1.000000e+00 : f32
    %5 = vector.broadcast %cst_1 : f32 to vector<1x2048xf32>
    %6 = arith.addf %5, %4 : vector<1x2048xf32>
    %7 = arith.divf %5, %6 : vector<1x2048xf32>
    %8 = arith.mulf %0, %7 : vector<1x2048xf32>
    %c0_2 = arith.constant 0 : index
    %c0_3 = arith.constant 0 : index
    %9 = vector.load %arg2[%c0_2, %c0_3] : memref<1x2048xf32, #tpu.memory_space<vmem>>, vector<1x2048xf32>
    tpu.vector_store %arg2[%c0_2, %c0_3], %8 {strides = array<i32>} : memref<1x2048xf32, #tpu.memory_space<vmem>>, vector<1x2048xf32>,
    return
  }
  func.func @transform_0(%arg0: i32) -> (i32, i32) {
    %c0_i32 = arith.constant 0 : i32
    %c0_i32_0 = arith.constant 0 : i32
    return %arg0, %c0_i32 : i32, i32
  }
  func.func @transform_1(%arg0: i32) -> (i32, i32) {
    %c0_i32 = arith.constant 0 : i32
    %c0_i32_0 = arith.constant 0 : i32
    return %arg0, %c0_i32 : i32, i32
  }
}

</mosaic_0001>

<bundles_post_ra>
// kernel: tpu_custom_call.1
= control target key start
LH: loop header
LB: loop body
LE: loop exit
PB: predicated region body
PF: predicated region fallthrough
CT: control target
= control target key end

     0   :  { %6 = vsyncpa [#allocation3], 0  ;;  %s128_s0 = inlined_call_operand.hbm [shape: f32[1,2048], index: 0, kind: input, shape index: {}]   ;;  %s129_s1 = inlined_call_operand.hbm [shape: f32[1,2048], index: 1, kind: output, shape index: {}]  }
   0x1   :  { %7 = vsyncpa [#allocation4], 0  ;;  %s110_s6 = smov [#allocation2]  }
   0x2   :  { %s14_s7 = sshll.u32 %s110_s6, 4  ;;  %s15_s7 = int_to_ptr.vmem [resolvable:$true] %s14_s7 }
   0x3   :  { %s74_s8 = scalar_lea.vmem %s15_s7, 256  ;;  %p79_p1 = scmp.lt.s32.totalorder %s15_s7, %s15_s7 }
   0x4   :  { %p75_p0 = scmp.ne.s32.totalorder %s15_s7, %s74_s8  ;;  %p80_p2 = scmp.lt.s32.totalorder %s74_s8, %s74_s8 }
   0x6   :  { %p81_p3 = por %p80_p2, %p79_p1 }
   0x8   :  { %p82_p4 = pnand %p81_p3, %p75_p0 }
   0xa   :  { %85 = shalt.err (!%p82_p4)
}
   0xb   :  { %17 = dma.hbm_to_vmem [thread:$0]  %s128_s0, 256, %s15_s7, [#allocation3]  }
   0xc   :  { %106 = dma.done.wait [#allocation3], 256  }
   0xd   :  { %107 = vsyncadd [#allocation3], 4294967040  ;;  %v21_v0 = vld [vmem:[#allocation2] sm:$0xff]  ;;  %v22_v1 = vld [vmem:[#allocation2 + $0x8] sm:$0xff]  ;;  %s111_s11 = smov [#allocation5]  }
   0xe   :  { %v54_v2 = vmul.f32 -1.442695, %v21_v0  ;;  %v55_v3 = vmul.f32 -1.442695, %v22_v1  ;;  %s45_s12 = sshll.u32 %s111_s11, 4  ;;  %s46_s12 = int_to_ptr.vmem [resolvable:$true] %s45_s12 }
   0xf   :  { %s86_s0 = scalar_lea.vmem %s46_s12, 256  ;;  %p91_p6 = scmp.lt.s32.totalorder %s46_s12, %s46_s12 }
  0x10   :  { %58 = vpow2.f32 %v54_v2  ;;  %p87_p5 = scmp.ne.s32.totalorder %s46_s12, %s86_s0  ;;  %p92_p7 = scmp.lt.s32.totalorder %s86_s0, %s86_s0 }
  0x11   :  { %60 = vpow2.f32 %v55_v3 }
  0x12   :  { %p93_p8 = por %p92_p7, %p91_p6 }
  0x14   :  { %p94_p9 = pnand %p93_p8, %p87_p5 }
  0x1d   :  { %v59_v4 = vpop.eup %58 }
  0x1e   :  { %v61_v5 = vpop.eup %60  ;;  %v29_v6 = vadd.f32 1.0, %v59_v4 }
  0x1f   :  { %v30_v7 = vadd.f32 1.0, %v61_v5 }
  0x20   :  { %62 = vrcp.f32 %v29_v6 }
  0x21   :  { %64 = vrcp.f32 %v30_v7 }
  0x2d   :  { %v63_v8 = vpop.eup %62 }
  0x2e   :  { %v65_v9 = vpop.eup %64  ;;  %v35_v10 = vmul.f32 %v63_v8, %v21_v0 }
  0x2f   :  { %v36_v11 = vmul.f32 %v65_v9, %v22_v1 }
  0x30   :  { %37 = vst [vmem:[#allocation5] sm:$0xff] %v35_v10 }
  0x31   :  { %38 = vst [vmem:[#allocation5 + $0x8] sm:$0xff] %v36_v11 }
  0x32   :  { %97 = shalt.err (!%p94_p9)
}
  0x33   :  { %48 = dma.vmem_to_hbm [thread:$0]  %s46_s12, 256, %s129_s1, [#allocation4]  }
  0x34   :  { %108 = dma.done.wait [#allocation4], 256  }
  0x35   :  { %109 = vsyncadd [#allocation4], 4294967040 }
  0x36   :  { %52 = vsyncpa [#allocation3], 1 }
  0x37   :  { %53 = vsyncpa [#allocation4], 1 }

</bundles_post_ra>
